<compile_context>
chip_gen: v5e
topology: v5e:2x2
jax: 0.10.0
libtpu: 0.0.40
codegen_flags: <defaults>
</compile_context>

<pallas_src>
import jax
import jax.numpy as jnp
from jax.experimental import pallas as pl
from jax.experimental.pallas import tpu as pltpu


def _round_up(x, m):
    return (x + m - 1) // m * m


def _pad2d(x, rows, cols, dtype):
    r, c = x.shape
    return jnp.pad(x.astype(dtype), ((0, rows - r), (0, cols - c)))


def _vmem_limit_bytes():
    """Generation-aware scoped-VMEM budget (v5e/v6e: ~96 MiB, v7x: ~48 MiB)."""
    try:
        cap = int(pltpu.get_tpu_info().vmem_capacity_bytes)
    except Exception:
        cap = 64 * 1024 * 1024  # conservative fallback (v7x-sized)
    return max(32 * 1024 * 1024, min(cap * 3 // 4, 100 * 1024 * 1024))


def _pick_node_tiles(n_pad128):
    """Pick (TM, TK) for the node axis: large tiles to amortize per-step
    pipeline overhead, but keep >= 2 M blocks where possible (v7x megacore)."""
    candidates = (1024, 512, 256, 128)
    tk = next(c for c in candidates if c <= n_pad128)
    tm_cap = n_pad128 // 2 if n_pad128 >= 256 else n_pad128
    tm = next(c for c in candidates if c <= tm_cap)
    return tm, tk


def _pick_feature_tile(f_pad):
    """Feature-axis (lane) tile: whole width when small, else 512/256/128."""
    for c in (512, 256, 128):
        if f_pad >= c and f_pad % c == 0:
            return c
    return f_pad


# ----------------------------------------------------------------------------
# Kernel 1: H = Z @ W   (single dot per large M tile; no K grid, no scratch)
# ----------------------------------------------------------------------------
def _xw_kernel(z_ref, w_ref, h_ref):
    h_ref[...] = jnp.dot(
        z_ref[...].astype(jnp.bfloat16), w_ref[...],
        preferred_element_type=jnp.float32,
    ).astype(h_ref.dtype)


def xw_pallas(z, w, *, tm, vmem_limit):
    m, k = z.shape
    _, n = w.shape
    assert m % tm == 0
    tn = _pick_feature_tile(n)
    grid = (m // tm, n // tn)
    return pl.pallas_call(
        _xw_kernel,
        out_shape=jax.ShapeDtypeStruct((m, n), jnp.bfloat16),
        grid=grid,
        in_specs=[
            pl.BlockSpec((tm, k), lambda i, j: (i, 0)),   # Z panel (f32, full K)
            pl.BlockSpec((k, tn), lambda i, j: (0, j)),   # W (bf16, tiny)
        ],
        out_specs=pl.BlockSpec((tm, tn), lambda i, j: (i, j)),
        compiler_params=pltpu.CompilerParams(
            dimension_semantics=("parallel", "parallel"),
            vmem_limit_bytes=vmem_limit,
        ),
    )(z, w)


# ----------------------------------------------------------------------------
# Kernel 2: Z = relu(A_hat @ H + b)   (large M/K tiles, f32 accumulator,
#                                      bias folded into accumulator init)
# ----------------------------------------------------------------------------
def _aggregate_kernel(a_ref, h_ref, b_ref, o_ref, acc_ref):
    kk = pl.program_id(2)

    @pl.when(kk == 0)
    def _():
        acc_ref[...] = jnp.broadcast_to(b_ref[...], acc_ref.shape)

    acc_ref[...] += jnp.dot(a_ref[...], h_ref[...],
                            preferred_element_type=jnp.float32)

    @pl.when(kk == pl.num_programs(2) - 1)
    def _():
        o_ref[...] = jnp.maximum(acc_ref[...], 0.0).astype(o_ref.dtype)


def aggregate_pallas(a_hat, h, b, *, tm, tk, vmem_limit):
    m, k = a_hat.shape
    _, n = h.shape
    tn = _pick_feature_tile(n)
    assert m % tm == 0 and k % tk == 0 and n % tn == 0
    grid = (m // tm, n // tn, k // tk)   # reduction (node/K) axis last
    return pl.pallas_call(
        _aggregate_kernel,
        out_shape=jax.ShapeDtypeStruct((m, n), jnp.float32),
        grid=grid,
        in_specs=[
            pl.BlockSpec((tm, tk), lambda i, j, kk: (i, kk)),  # A_hat tile (bf16)
            pl.BlockSpec((tk, tn), lambda i, j, kk: (kk, j)),  # H tile (bf16)
            pl.BlockSpec((1, tn), lambda i, j, kk: (0, j)),    # bias (f32)
        ],
        out_specs=pl.BlockSpec((tm, tn), lambda i, j, kk: (i, j)),
        scratch_shapes=[pltpu.VMEM((tm, tn), jnp.float32)],
        compiler_params=pltpu.CompilerParams(
            dimension_semantics=("parallel", "parallel", "arbitrary"),
            vmem_limit_bytes=vmem_limit,
        ),
    )(a_hat, h, b)


# ----------------------------------------------------------------------------
# Plain-JAX glue: build normalized dense adjacency (gcn_norm with self-loops)
# ----------------------------------------------------------------------------
def build_normalized_adjacency(edge_index, edge_weight, num_nodes):
    src = edge_index[0]
    dst = edge_index[1]
    a = jnp.zeros((num_nodes, num_nodes), jnp.float32)
    # message flows src -> dst  =>  A[dst, src] accumulates edge weight
    a = a.at[dst, src].add(edge_weight.astype(jnp.float32))
    a = a + jnp.eye(num_nodes, dtype=jnp.float32)           # self-loops, weight 1
    deg = a.sum(axis=1)                                      # weighted in-degree
    d_inv_sqrt = jnp.where(deg > 0, 1.0 / jnp.sqrt(deg), 0.0)
    return d_inv_sqrt[:, None] * a * d_inv_sqrt[None, :]
# TODO(synk): real graphs are >>99% sparse; replace this dense N^2 build with a
# block-sparse layout feeding a PrefetchScalarGridSpec aggregate kernel.


# ----------------------------------------------------------------------------
# GConv forward: stack of num_layers GCNConv layers with ReLU after each
# ----------------------------------------------------------------------------
def gconv_forward(x, edge_index, edge_weight, params):
    n, f_in = x.shape
    a_hat = build_normalized_adjacency(edge_index, edge_weight, n)

    tm, tk = _pick_node_tiles(_round_up(n, 128))
    n_pad = _round_up(n, max(tm, tk))          # tm | tk chain of powers of two
    vmem_limit = _vmem_limit_bytes()

    a_pad = _pad2d(a_hat, n_pad, n_pad, jnp.bfloat16)
    z = _pad2d(x, n_pad, _round_up(f_in, 128), jnp.float32)   # Z kept f32

    for (w, b) in params:
        fi, fo = w.shape
        fi_pad = _round_up(fi, 128)
        fo_pad = _round_up(fo, 128)
        assert z.shape[1] == fi_pad
        # Padded rows/cols of W and b MUST stay exactly zero (see header note).
        w_pad = _pad2d(w, fi_pad, fo_pad, jnp.bfloat16)
        b_pad = jnp.pad(b.astype(jnp.float32), (0, fo_pad - fo)).reshape(1, fo_pad)

        h = xw_pallas(z, w_pad, tm=tm, vmem_limit=vmem_limit)          # bf16
        z = aggregate_pallas(a_pad, h, b_pad, tm=tm, tk=tk,
                             vmem_limit=vmem_limit)                    # f32

    f_out = params[-1][0].shape[1]
    return z[:n, :f_out]


def init_gconv_params(key, input_dim, hidden_dim, num_layers):
    """Deterministic glorot-uniform weights + zero bias, mirroring GCNConv init."""
    params = []
    dims = [input_dim] + [hidden_dim] * num_layers
    for i in range(num_layers):
        key, sub = jax.random.split(key)
        fan_in, fan_out = dims[i], dims[i + 1]
        limit = jnp.sqrt(6.0 / (fan_in + fan_out))
        w = jax.random.uniform(sub, (fan_in, fan_out), jnp.float32, -limit, limit)
        b = jnp.zeros((fan_out,), jnp.float32)
        params.append((w, b))
    return params


# Pure-JAX f32 reference (same math, no Pallas, no bf16)
def gconv_reference(x, edge_index, edge_weight, params):
    a_hat = build_normalized_adjacency(edge_index, edge_weight, x.shape[0])
    z = x
    for (w, b) in params:
        z = jnp.maximum(a_hat @ (z @ w) + b[None, :], 0.0)
    return z


if __name__ == "__main__":
    key = jax.random.PRNGKey(0)

    num_nodes = 16
    input_dim = 16
    hidden_dim = 32
    num_layers = 2
    num_edges = 32

    k_x, k_src, k_dst, k_w, k_p = jax.random.split(key, 5)
    x = jax.random.normal(k_x, (num_nodes, input_dim), jnp.float32)
    src = jax.random.randint(k_src, (num_edges,), 0, num_nodes)
    dst = jax.random.randint(k_dst, (num_edges,), 0, num_nodes)
    edge_index = jnp.stack([src, dst], axis=0)                 # [2, E]
    edge_weight = jax.random.uniform(k_w, (num_edges,), jnp.float32, 0.1, 1.0)

    params = init_gconv_params(k_p, input_dim, hidden_dim, num_layers)

    out = gconv_forward(x, edge_index, edge_weight, params)
    out = jax.block_until_ready(out)

    ref = jax.block_until_ready(gconv_reference(x, edge_index, edge_weight, params))
    assert out.shape == (num_nodes, hidden_dim)
    # Tolerance loosened vs the f32 reference because A_hat / W / H feed the
    # MXU in bfloat16 (with f32 accumulation and f32 inter-layer Z).
    assert jnp.allclose(out, ref, atol=3e-2, rtol=3e-2), "mismatch vs reference"

    print("KERNEL_OK")
</pallas_src>

<mosaic_0001>
module attributes {stable_mosaic.version = 11 : i64} {
  func.func @_xw_kernel(%arg0: i32, %arg1: i32, %arg2: memref<128x128xf32, #tpu.memory_space<vmem>>, %arg3: memref<128x128xbf16, #tpu.memory_space<vmem>>, %arg4: memref<128x128xbf16, #tpu.memory_space<vmem>>) attributes {dimension_semantics = [#tpu.dimension_semantics<parallel>, #tpu.dimension_semantics<parallel>], iteration_bounds = array<i64: 1, 1>, scalar_prefetch = 0 : i64, scratch_operands = 0 : i64, tpu.core_type = #tpu.core_type<tc>, window_params = [{transform_indices = @transform_0, window_bounds = array<i64: 128, 128>}, {transform_indices = @transform_1, window_bounds = array<i64: 128, 128>}, {transform_indices = @transform_2, window_bounds = array<i64: 128, 128>}]} {
    %c0 = arith.constant 0 : index
    %c0_0 = arith.constant 0 : index
    %0 = vector.load %arg2[%c0, %c0_0] : memref<128x128xf32, #tpu.memory_space<vmem>>, vector<128x128xf32>
    %1 = arith.truncf %0 : vector<128x128xf32> to vector<128x128xbf16>
    %c0_1 = arith.constant 0 : index
    %c0_2 = arith.constant 0 : index
    %2 = vector.load %arg3[%c0_1, %c0_2] : memref<128x128xbf16, #tpu.memory_space<vmem>>, vector<128x128xbf16>
    %cst = arith.constant dense<0.000000e+00> : vector<128x128xf32>
    %3 = tpu.matmul %1, %2, %cst {dimension_numbers = #tpu.dot_dimension_numbers<[1], [0], [0], [1], [0, 0, 1, 1], [], []>} : vector<128x128xbf16>, vector<128x128xbf16>, vector<128x128xf32> -> vector<128x128xf32>
    %4 = arith.truncf %3 : vector<128x128xf32> to vector<128x128xbf16>
    %c0_3 = arith.constant 0 : index
    %c0_4 = arith.constant 0 : index
    %5 = vector.load %arg4[%c0_3, %c0_4] : memref<128x128xbf16, #tpu.memory_space<vmem>>, vector<128x128xbf16>
    tpu.vector_store %arg4[%c0_3, %c0_4], %4 {strides = array<i32>} : memref<128x128xbf16, #tpu.memory_space<vmem>>, vector<128x128xbf16>,
    return
  }
  func.func @transform_0(%arg0: i32, %arg1: i32) -> (i32, i32) {
    %c0_i32 = arith.constant 0 : i32
    %c0_i32_0 = arith.constant 0 : i32
    return %arg0, %c0_i32 : i32, i32
  }
  func.func @transform_1(%arg0: i32, %arg1: i32) -> (i32, i32) {
    %c0_i32 = arith.constant 0 : i32
    %c0_i32_0 = arith.constant 0 : i32
    return %c0_i32, %arg1 : i32, i32
  }
  func.func @transform_2(%arg0: i32, %arg1: i32) -> (i32, i32) {
    %c0_i32 = arith.constant 0 : i32
    return %arg0, %arg1 : i32, i32
  }
}

</mosaic_0001>

<bundles_post_ra>
// kernel: tpu_custom_call.1
= control target key start
LH: loop header
LB: loop body
LE: loop exit
PB: predicated region body
PF: predicated region fallthrough
CT: control target
= control target key end

     0   :  { %7 = vsyncpa [#allocation3], 0  ;;  %s466_s0 = inlined_call_operand.hbm [shape: f32[128,128], index: 0, kind: input, shape index: {}]   ;;  %s467_s1 = inlined_call_operand.hbm [shape: bf16[128,128], index: 1, kind: input, shape index: {}]   ;;  %s468_s2 = inlined_call_operand.hbm [shape: bf16[128,128], index: 2, kind: output, shape index: {}]  }
   0x1   :  { %8 = vsyncpa [#allocation6], 0 }
   0x2   :  { %9 = vsyncpa [#allocation4], 0  ;;  %s14_s11 = sshll.u32 %s466_s0, 4  ;;  %s429_s12 = smov [#allocation2]   ;;  %s15_s11 = int_to_ptr.hbm [resolvable:$true] %s14_s11 }
   0x3   :  { %s16_s13 = sshll.u32 %s429_s12, 4  ;;  %s27_s16 = sshll.u32 %s467_s1, 4  ;;  %s17_s13 = int_to_ptr.vmem [resolvable:$true] %s16_s13  ;;  %s28_s16 = int_to_ptr.hbm [resolvable:$true] %s27_s16 }
   0x4   :  { %s430_s17 = smov 128   ;;  %s431_s18 = smov 8  }
   0x5   :  { %22 = dma.hbm_to_vmem [thread:$0]  %s15_s11, 2048, %s17_s13, [#allocation3], %s430_s17, %s430_s17, %s431_s18  }
   0x6   :  { %s432_s19 = smov [#allocation5]   ;;  %s433_s21 = smov 64  }
   0x7   :  { %s29_s20 = sshll.u32 %s432_s19, 4  ;;  %s434_s22 = smov 4   ;;  %s30_s20 = int_to_ptr.vmem [resolvable:$true] %s29_s20 }
   0x8   :  { %35 = dma.hbm_to_vmem [thread:$0]  %s28_s16, 1024, %s30_s20, [#allocation6], %s433_s21, %s433_s21, %s434_s22  }
   0x9   :  { %423 = dma.done.wait [#allocation3], 2048  }
   0xa   :  { %424 = vsyncadd [#allocation3], 4294965248 }
   0xb   :  { %425 = dma.done.wait [#allocation6], 1024  }
   0xc   :  { %426 = vsyncadd [#allocation6], 4294966272  ;;  %v272_v0 = vld [vmem:[#allocation5 + $0x38] sm:$0xff]  ;;  %v271_v1 = vld [vmem:[#allocation5 + $0x30] sm:$0xff]  ;;  %s435_s0 = smov [#allocation7]   ;;  %s219_s25 = sshll.u32 %s468_s2, 4  ;;  %s220_s25 = int_to_ptr.hbm [resolvable:$true] %s219_s25 }
   0xd   :  { %132 = vmatpush.bf16.msra.mxu0 %v272_v0  ;;  %320 = vmatpush.bf16.msra.mxu1 %v272_v0  ;;  %v270_v2 = vld [vmem:[#allocation5 + $0x28] sm:$0xff]  ;;  %v269_v3 = vld [vmem:[#allocation5 + $0x20] sm:$0xff]  ;;  %v268_v4 = vld [vmem:[#allocation5 + $0x18] sm:$0xff]  ;;  %s217_s1 = sshll.u32 %s435_s0, 4  ;;  %s218_s1 = int_to_ptr.vmem [resolvable:$true] %s217_s1 }
   0xe   :  { %321 = vmatpush.bf16.msra.mxu2 %v272_v0  ;;  %322 = vmatpush.bf16.msra.mxu3 %v272_v0  ;;  %v267_v5 = vld [vmem:[#allocation5 + $0x10] sm:$0xff]  ;;  %v266_v6 = vld [vmem:[#allocation5 + $0x8] sm:$0xff]  ;;  %v265_v7 = vld [vmem:[#allocation5] sm:$0xff] }
   0xf   :  { %v44_v8 = vld [vmem:[#allocation2] sm:$0xff]  ;;  %v45_v9 = vld [vmem:[#allocation2 + $0x8] sm:$0xff]  ;;  %v46_v20 = vld [vmem:[#allocation2 + $0x10] sm:$0xff] }
  0x10   :  { %v48_v10 = vld [vmem:[#allocation2 + $0x20] sm:$0xff]  ;;  %v49_v11 = vld [vmem:[#allocation2 + $0x28] sm:$0xff]  ;;  %v60_v16 = vpack.c.bf16 %v45_v9, %v44_v8  ;;  %v47_v21 = vld [vmem:[#allocation2 + $0x18] sm:$0xff] }
  0x11   :  { %133 = vmatpush.bf16.msra.mxu0 %v271_v1  ;;  %323 = vmatpush.bf16.msra.mxu1 %v271_v1  ;;  %v52_v12 = vld [vmem:[#allocation2 + $0x40] sm:$0xff]  ;;  %v53_v13 = vld [vmem:[#allocation2 + $0x48] sm:$0xff]  ;;  %v62_v17 = vpack.c.bf16 %v49_v11, %v48_v10  ;;  %v50_v22 = vld [vmem:[#allocation2 + $0x30] sm:$0xff]  ;;  %v61_v28 = vpack.c.bf16 %v47_v21, %v46_v20 }
  0x12   :  { %324 = vmatpush.bf16.msra.mxu2 %v271_v1  ;;  %325 = vmatpush.bf16.msra.mxu3 %v271_v1  ;;  %v56_v14 = vld [vmem:[#allocation2 + $0x60] sm:$0xff]  ;;  %v57_v15 = vld [vmem:[#allocation2 + $0x68] sm:$0xff]  ;;  %v64_v18 = vpack.c.bf16 %v53_v13, %v52_v12  ;;  %v51_v23 = vld [vmem:[#allocation2 + $0x38] sm:$0xff] }
  0x13   :  { %v66_v19 = vpack.c.bf16 %v57_v15, %v56_v14  ;;  %v54_v24 = vld [vmem:[#allocation2 + $0x50] sm:$0xff]  ;;  %v55_v25 = vld [vmem:[#allocation2 + $0x58] sm:$0xff]  ;;  %v63_v29 = vpack.c.bf16 %v51_v23, %v50_v22 }
  0x14   :  { %v58_v26 = vld [vmem:[#allocation2 + $0x70] sm:$0xff]  ;;  %v59_v27 = vld [vmem:[#allocation2 + $0x78] sm:$0xff]  ;;  %v65_v30 = vpack.c.bf16 %v55_v25, %v54_v24 }
  0x15   :  { %134 = vmatpush.bf16.msra.mxu0 %v270_v2  ;;  %326 = vmatpush.bf16.msra.mxu1 %v270_v2  ;;  %v67_v31 = vpack.c.bf16 %v59_v27, %v58_v26 }
  0x16   :  { %327 = vmatpush.bf16.msra.mxu2 %v270_v2  ;;  %328 = vmatpush.bf16.msra.mxu3 %v270_v2 }
  0x19   :  { %135 = vmatpush.bf16.msra.mxu0 %v269_v3  ;;  %329 = vmatpush.bf16.msra.mxu1 %v269_v3 }
  0x1a   :  { %330 = vmatpush.bf16.msra.mxu2 %v269_v3  ;;  %331 = vmatpush.bf16.msra.mxu3 %v269_v3 }
  0x1d   :  { %136 = vmatpush.bf16.msra.mxu0 %v268_v4  ;;  %332 = vmatpush.bf16.msra.mxu1 %v268_v4 }
  0x1e   :  { %333 = vmatpush.bf16.msra.mxu2 %v268_v4  ;;  %334 = vmatpush.bf16.msra.mxu3 %v268_v4 }
  0x21   :  { %137 = vmatpush.bf16.msra.mxu0 %v267_v5  ;;  %335 = vmatpush.bf16.msra.mxu1 %v267_v5 }
  0x22   :  { %336 = vmatpush.bf16.msra.mxu2 %v267_v5  ;;  %337 = vmatpush.bf16.msra.mxu3 %v267_v5 }
  0x25   :  { %138 = vmatpush.bf16.msra.mxu0 %v266_v6  ;;  %338 = vmatpush.bf16.msra.mxu1 %v266_v6 }
  0x26   :  { %339 = vmatpush.bf16.msra.mxu2 %v266_v6  ;;  %340 = vmatpush.bf16.msra.mxu3 %v266_v6 }
  0x29   :  { %139 = vmatpush.bf16.msra.mxu0 %v265_v7  ;;  %341 = vmatpush.bf16.msra.mxu1 %v265_v7 }
  0x2a   :  { %342 = vmatpush.bf16.msra.mxu2 %v265_v7  ;;  %343 = vmatpush.bf16.msra.mxu3 %v265_v7 }
  0x2c   :  { %140 = vmatmul.bf16.vlgmr.msra.gmra.mxu0 %v60_v16  ;;  %150 = vmatmul.bf16.vlgmr.msra.gmra.mxu1 %v62_v17 }
  0x2d   :  { %160 = vmatmul.bf16.vlgmr.msra.gmra.mxu2 %v64_v18  ;;  %170 = vmatmul.bf16.vlgmr.msra.gmra.mxu3 %v66_v19 }
  0x3c   :  { %145 = vmatmul.bf16.gmra.mxu0 %v61_v28  ;;  %155 = vmatmul.bf16.gmra.mxu1 %v63_v29 }
  0x3d   :  { %165 = vmatmul.bf16.gmra.mxu2 %v65_v30  ;;  %175 = vmatmul.bf16.gmra.mxu3 %v67_v31 }
  0xa9   :  { %v141_v32 = vpop.f32.mrf.mxu0  ;;  %v151_v33 = vpop.f32.mrf.mxu1 }
  0xb0   :  { %v161_v34 = vpop.f32.mrf.mxu2  ;;  %v171_v35 = vpop.f32.mrf.mxu3 }
  0xb1   :  { %v143_v36 = vpop.f32.mrf.mxu0  ;;  %v153_v37 = vpop.f32.mrf.mxu1 }
  0xb2   :  { %v276_v38 = vpack.c.bf16 %v143_v36, %v141_v32  ;;  %v286_v39 = vpack.c.bf16 %v153_v37, %v151_v33 }
  0xb4   :  { %277 = vst [vmem:[#allocation7] sm:$0xff] %v276_v38  }
  0xb5   :  { %314 = vst [vmem:[#allocation7 + $0x10] sm:$0xff] %v286_v39  }
  0xb8   :  { %v163_v40 = vpop.f32.mrf.mxu2  ;;  %v173_v41 = vpop.f32.mrf.mxu3 }
  0xb9   :  { %v296_v42 = vpack.c.bf16 %v163_v40, %v161_v34  ;;  %v306_v43 = vpack.c.bf16 %v173_v41, %v171_v35  ;;  %v146_v44 = vpop.f32.mrf.mxu0  ;;  %v156_v45 = vpop.f32.mrf.mxu1 }
  0xbb   :  { %316 = vst [vmem:[#allocation7 + $0x20] sm:$0xff] %v296_v42  }
  0xbc   :  { %318 = vst [vmem:[#allocation7 + $0x30] sm:$0xff] %v306_v43  }
  0xc0   :  { %v166_v46 = vpop.f32.mrf.mxu2  ;;  %v176_v47 = vpop.f32.mrf.mxu3 }
  0xc1   :  { %v148_v48 = vpop.f32.mrf.mxu0  ;;  %v158_v49 = vpop.f32.mrf.mxu1 }
  0xc2   :  { %v281_v50 = vpack.c.bf16 %v148_v48, %v146_v44  ;;  %v291_v51 = vpack.c.bf16 %v158_v49, %v156_v45 }
  0xc4   :  { %313 = vst [vmem:[#allocation7 + $0x8] sm:$0xff] %v281_v50  }
  0xc5   :  { %315 = vst [vmem:[#allocation7 + $0x18] sm:$0xff] %v291_v51  }
  0xc8   :  { %v168_v52 = vpop.f32.mrf.mxu2  ;;  %v178_v53 = vpop.f32.mrf.mxu3 }
  0xc9   :  { %v301_v54 = vpack.c.bf16 %v168_v52, %v166_v46  ;;  %v311_v55 = vpack.c.bf16 %v178_v53, %v176_v47 }
  0xcb   :  { %317 = vst [vmem:[#allocation7 + $0x28] sm:$0xff] %v301_v54  }
  0xcc   :  { %319 = vst [vmem:[#allocation7 + $0x38] sm:$0xff] %v311_v55  }
  0xcd   :  { %225 = dma.vmem_to_hbm [thread:$0]  %s218_s1, 1024, %s220_s25, [#allocation4], %s433_s21, %s433_s21, %s434_s22  }
  0xce   :  { %427 = dma.done.wait [#allocation4], 1024  }
  0xcf   :  { %428 = vsyncadd [#allocation4], 4294966272 }
  0xd0   :  { %230 = vsyncpa [#allocation3], 1 }
  0xd1   :  { %231 = vsyncpa [#allocation6], 1 }
  0xd2   :  { %232 = vsyncpa [#allocation4], 1 }

</bundles_post_ra>
